<compile_context>
chip_gen: v7x
topology: tpu7x:2x2x1
jax: 0.10.0
libtpu: 0.0.40
codegen_flags: <defaults>
</compile_context>

<pallas_src>
import functools

import jax
import jax.numpy as jnp
from jax.experimental import pallas as pl
from jax.experimental.pallas import tpu as pltpu

LANE = 128  # TPU lane width: keep streamed last dims multiples of 128.


def _round_up(n, m):
    return ((n + m - 1) // m) * m


def mlp_kernel(x_ref, w1_ref, b1_ref, w2_ref, b2_ref,
               w3_ref, b3_ref, w4_ref, b4_ref, out_ref):
    """One (TILE_B, 128) batch tile through the whole fused 4-layer MLP.

    Weights/activation tiles are bf16 (MXU native); all matmul accumulation,
    bias adds and ReLUs are f32.
    """
    x = x_ref[...]                                                   # (TB, 128) bf16

    h = jnp.dot(x, w1_ref[...], preferred_element_type=jnp.float32) + b1_ref[...]
    h = jnp.maximum(h, 0.0).astype(x.dtype)                          # (TB, 64)

    h = jnp.dot(h, w2_ref[...], preferred_element_type=jnp.float32) + b2_ref[...]
    h = jnp.maximum(h, 0.0).astype(x.dtype)                          # (TB, 128)

    h = jnp.dot(h, w3_ref[...], preferred_element_type=jnp.float32) + b3_ref[...]
    h = jnp.maximum(h, 0.0).astype(x.dtype)                          # (TB, 64)

    out_ref[...] = (jnp.dot(h, w4_ref[...], preferred_element_type=jnp.float32)
                    + b4_ref[...])                                   # (TB, 128) f32


@functools.partial(jax.jit, static_argnames=("tile_b", "compute_dtype"))
def cart_pole_mlp_forward(x, params, *, tile_b=256, compute_dtype=jnp.bfloat16):
    (w1, b1), (w2, b2), (w3, b3), (w4, b4) = params
    batch, state_dim = x.shape
    n_actions = w4.shape[1]

    d_in = _round_up(state_dim, LANE)      # 4  -> 128 : lane-dense x loads
    d_out = _round_up(n_actions, LANE)     # 2  -> 128 : lane-dense out stores
    b_pad = _round_up(batch, tile_b)       # pad batch to a whole number of tiles

    # Zero padding on the extra rows/lanes leaves the real outputs unchanged.
    x_p = jnp.zeros((b_pad, d_in), compute_dtype).at[:batch, :state_dim].set(
        x.astype(compute_dtype))
    w1_p = jnp.zeros((d_in, 64), compute_dtype).at[:state_dim, :].set(
        w1.astype(compute_dtype))
    w2_c = w2.astype(compute_dtype)
    w3_c = w3.astype(compute_dtype)
    w4_p = jnp.zeros((64, d_out), compute_dtype).at[:, :n_actions].set(
        w4.astype(compute_dtype))
    b4_p = jnp.zeros((1, d_out), jnp.float32).at[:, :n_actions].set(b4)

    grid = (b_pad // tile_b,)

    flops = 2 * b_pad * (d_in * 64 + 64 * 128 + 128 * 64 + 64 * d_out)
    bytes_accessed = (
        x_p.size * x_p.dtype.itemsize                       # x tiles in
        + b_pad * d_out * 4                                 # out tiles
        + sum(a.size * a.dtype.itemsize                     # resident params
              for a in (w1_p, b1, w2_c, b2, w3_c, b3, w4_p, b4_p)))

    resident = lambda i: (0, 0)   # weights/biases: one block, stays in VMEM

    out_p = pl.pallas_call(
        mlp_kernel,
        out_shape=jax.ShapeDtypeStruct((b_pad, d_out), jnp.float32),
        grid=grid,
        in_specs=[
            pl.BlockSpec((tile_b, d_in), lambda i: (i, 0)),  # x: streamed per tile
            pl.BlockSpec(w1_p.shape, resident),
            pl.BlockSpec(b1.shape, resident),
            pl.BlockSpec(w2_c.shape, resident),
            pl.BlockSpec(b2.shape, resident),
            pl.BlockSpec(w3_c.shape, resident),
            pl.BlockSpec(b3.shape, resident),
            pl.BlockSpec(w4_p.shape, resident),
            pl.BlockSpec(b4_p.shape, resident),
        ],
        out_specs=pl.BlockSpec((tile_b, d_out), lambda i: (i, 0)),
        compiler_params=pltpu.CompilerParams(
            dimension_semantics=("parallel",)),               # megacore on v7x
        cost_estimate=pl.CostEstimate(
            flops=flops, transcendentals=0, bytes_accessed=bytes_accessed),
    )(x_p, w1_p, b1, w2_c, b2, w3_c, b3, w4_p, b4_p)

    return out_p[:batch, :n_actions]


def init_linear(key, fan_in, fan_out):
    """Deterministic init mimicking PyTorch nn.Linear default:
    U(-1/sqrt(fan_in), 1/sqrt(fan_in)) for both weight and bias."""
    kw, kb = jax.random.split(key)
    bound = 1.0 / jnp.sqrt(jnp.float32(fan_in))
    # stored as (in, out) so the kernel does x @ W (== PyTorch x @ W.T)
    w = jax.random.uniform(kw, (fan_in, fan_out), jnp.float32, -bound, bound)
    b = jax.random.uniform(kb, (1, fan_out), jnp.float32, -bound, bound)
    return w, b


def init_params(key, state_dim, n_actions):
    k1, k2, k3, k4 = jax.random.split(key, 4)
    return (
        init_linear(k1, state_dim, 64),
        init_linear(k2, 64, 128),
        init_linear(k3, 128, 64),
        init_linear(k4, 64, n_actions),
    )


def reference_forward(x, params, compute_dtype=jnp.float32):
    """Plain-JAX reference. compute_dtype controls the matmul operand dtype
    (f32 = exact PyTorch semantics; bf16 = matches the kernel's operand dtype,
    always with f32 accumulation)."""
    h = x.astype(compute_dtype)
    for i, (w, b) in enumerate(params):
        h = jnp.dot(h, w.astype(compute_dtype),
                    preferred_element_type=jnp.float32) + b
        if i < len(params) - 1:
            h = jnp.maximum(h, 0.0).astype(compute_dtype)
    return h


if __name__ == "__main__":
    # CartPole shapes: state_dim=4, n_actions=2.  Batch of rolled-out
    # environments = 512 so the launch cost is amortized and the grid (2 tiles
    # of 256 rows) actually exercises the batch pipeline / parallel axis.
    state_dim, n_actions, batch = 4, 2, 512

    key = jax.random.PRNGKey(0)
    kx, kp = jax.random.split(key)
    x = jax.random.normal(kx, (batch, state_dim), dtype=jnp.float32)
    params = init_params(kp, state_dim, n_actions)

    out = cart_pole_mlp_forward(x, params, tile_b=256)
    out = jax.block_until_ready(out)
    assert out.shape == (batch, n_actions)

    # Check 1: against a bf16-operand / f32-accumulate reference (same dtypes
    # as the kernel) -> tight tolerance.
    ref_bf16 = reference_forward(x, params, compute_dtype=jnp.bfloat16)
    assert jnp.allclose(out, ref_bf16, atol=2e-2, rtol=2e-2)

    # Check 2: against the full-f32 PyTorch-semantics reference -> tolerance
    # loosened only for the bf16 weight quantization.
    ref_f32 = reference_forward(x, params, compute_dtype=jnp.float32)
    assert jnp.allclose(out, ref_f32, atol=5e-2, rtol=5e-2)

    print("KERNEL_OK")
</pallas_src>

<mosaic_0001>
module attributes {stable_mosaic.version = 11 : i64} {
  func.func @mlp_kernel(%arg0: i32, %arg1: memref<256x128xbf16, #tpu.memory_space<vmem>>, %arg2: memref<128x64xbf16, #tpu.memory_space<vmem>>, %arg3: memref<1x64xf32, #tpu.memory_space<vmem>>, %arg4: memref<64x128xbf16, #tpu.memory_space<vmem>>, %arg5: memref<1x128xf32, #tpu.memory_space<vmem>>, %arg6: memref<128x64xbf16, #tpu.memory_space<vmem>>, %arg7: memref<1x64xf32, #tpu.memory_space<vmem>>, %arg8: memref<64x128xbf16, #tpu.memory_space<vmem>>, %arg9: memref<1x128xf32, #tpu.memory_space<vmem>>, %arg10: memref<256x128xf32, #tpu.memory_space<vmem>>) attributes {dimension_semantics = [#tpu.dimension_semantics<parallel>], iteration_bounds = array<i64: 2>, scalar_prefetch = 0 : i64, scratch_operands = 0 : i64, tpu.core_type = #tpu.core_type<tc>, window_params = [{transform_indices = @transform_0, window_bounds = array<i64: 256, 128>}, {pipeline_mode = #tpu.pipeline_mode<synchronous>, transform_indices = @transform_1, window_bounds = array<i64: 128, 64>}, {pipeline_mode = #tpu.pipeline_mode<synchronous>, transform_indices = @transform_2, window_bounds = array<i64: 1, 64>}, {pipeline_mode = #tpu.pipeline_mode<synchronous>, transform_indices = @transform_3, window_bounds = array<i64: 64, 128>}, {pipeline_mode = #tpu.pipeline_mode<synchronous>, transform_indices = @transform_4, window_bounds = array<i64: 1, 128>}, {pipeline_mode = #tpu.pipeline_mode<synchronous>, transform_indices = @transform_5, window_bounds = array<i64: 128, 64>}, {pipeline_mode = #tpu.pipeline_mode<synchronous>, transform_indices = @transform_6, window_bounds = array<i64: 1, 64>}, {pipeline_mode = #tpu.pipeline_mode<synchronous>, transform_indices = @transform_7, window_bounds = array<i64: 64, 128>}, {pipeline_mode = #tpu.pipeline_mode<synchronous>, transform_indices = @transform_8, window_bounds = array<i64: 1, 128>}, {transform_indices = @transform_9, window_bounds = array<i64: 256, 128>}]} {
    %c0 = arith.constant 0 : index
    %c0_0 = arith.constant 0 : index
    %0 = vector.load %arg1[%c0, %c0_0] : memref<256x128xbf16, #tpu.memory_space<vmem>>, vector<256x128xbf16>
    %c0_1 = arith.constant 0 : index
    %c0_2 = arith.constant 0 : index
    %1 = vector.load %arg2[%c0_1, %c0_2] : memref<128x64xbf16, #tpu.memory_space<vmem>>, vector<128x64xbf16>
    %cst = arith.constant dense<0.000000e+00> : vector<256x64xf32>
    %2 = tpu.matmul %0, %1, %cst {dimension_numbers = #tpu.dot_dimension_numbers<[1], [0], [0], [1], [0, 0, 1, 1], [], []>} : vector<256x128xbf16>, vector<128x64xbf16>, vector<256x64xf32> -> vector<256x64xf32>
    %c0_3 = arith.constant 0 : index
    %c0_4 = arith.constant 0 : index
    %3 = vector.load %arg3[%c0_3, %c0_4] : memref<1x64xf32, #tpu.memory_space<vmem>>, vector<1x64xf32>
    %4 = vector.broadcast %3 : vector<1x64xf32> to vector<256x64xf32>
    %5 = arith.addf %2, %4 : vector<256x64xf32>
    %cst_5 = arith.constant 0.000000e+00 : f32
    %6 = vector.broadcast %cst_5 : f32 to vector<256x64xf32>
    %7 = arith.maximumf %5, %6 : vector<256x64xf32>
    %8 = arith.truncf %7 : vector<256x64xf32> to vector<256x64xbf16>
    %c0_6 = arith.constant 0 : index
    %c0_7 = arith.constant 0 : index
    %9 = vector.load %arg4[%c0_6, %c0_7] : memref<64x128xbf16, #tpu.memory_space<vmem>>, vector<64x128xbf16>
    %cst_8 = arith.constant dense<0.000000e+00> : vector<256x128xf32>
    %10 = tpu.matmul %8, %9, %cst_8 {dimension_numbers = #tpu.dot_dimension_numbers<[1], [0], [0], [1], [0, 0, 1, 1], [], []>} : vector<256x64xbf16>, vector<64x128xbf16>, vector<256x128xf32> -> vector<256x128xf32>
    %c0_9 = arith.constant 0 : index
    %c0_10 = arith.constant 0 : index
    %11 = vector.load %arg5[%c0_9, %c0_10] : memref<1x128xf32, #tpu.memory_space<vmem>>, vector<1x128xf32>
    %12 = vector.broadcast %11 : vector<1x128xf32> to vector<256x128xf32>
    %13 = arith.addf %10, %12 : vector<256x128xf32>
    %cst_11 = arith.constant 0.000000e+00 : f32
    %14 = vector.broadcast %cst_11 : f32 to vector<256x128xf32>
    %15 = arith.maximumf %13, %14 : vector<256x128xf32>
    %16 = arith.truncf %15 : vector<256x128xf32> to vector<256x128xbf16>
    %c0_12 = arith.constant 0 : index
    %c0_13 = arith.constant 0 : index
    %17 = vector.load %arg6[%c0_12, %c0_13] : memref<128x64xbf16, #tpu.memory_space<vmem>>, vector<128x64xbf16>
    %cst_14 = arith.constant dense<0.000000e+00> : vector<256x64xf32>
    %18 = tpu.matmul %16, %17, %cst_14 {dimension_numbers = #tpu.dot_dimension_numbers<[1], [0], [0], [1], [0, 0, 1, 1], [], []>} : vector<256x128xbf16>, vector<128x64xbf16>, vector<256x64xf32> -> vector<256x64xf32>
    %c0_15 = arith.constant 0 : index
    %c0_16 = arith.constant 0 : index
    %19 = vector.load %arg7[%c0_15, %c0_16] : memref<1x64xf32, #tpu.memory_space<vmem>>, vector<1x64xf32>
    %20 = vector.broadcast %19 : vector<1x64xf32> to vector<256x64xf32>
    %21 = arith.addf %18, %20 : vector<256x64xf32>
    %cst_17 = arith.constant 0.000000e+00 : f32
    %22 = vector.broadcast %cst_17 : f32 to vector<256x64xf32>
    %23 = arith.maximumf %21, %22 : vector<256x64xf32>
    %24 = arith.truncf %23 : vector<256x64xf32> to vector<256x64xbf16>
    %c0_18 = arith.constant 0 : index
    %c0_19 = arith.constant 0 : index
    %25 = vector.load %arg8[%c0_18, %c0_19] : memref<64x128xbf16, #tpu.memory_space<vmem>>, vector<64x128xbf16>
    %cst_20 = arith.constant dense<0.000000e+00> : vector<256x128xf32>
    %26 = tpu.matmul %24, %25, %cst_20 {dimension_numbers = #tpu.dot_dimension_numbers<[1], [0], [0], [1], [0, 0, 1, 1], [], []>} : vector<256x64xbf16>, vector<64x128xbf16>, vector<256x128xf32> -> vector<256x128xf32>
    %c0_21 = arith.constant 0 : index
    %c0_22 = arith.constant 0 : index
    %27 = vector.load %arg9[%c0_21, %c0_22] : memref<1x128xf32, #tpu.memory_space<vmem>>, vector<1x128xf32>
    %28 = vector.broadcast %27 : vector<1x128xf32> to vector<256x128xf32>
    %29 = arith.addf %26, %28 : vector<256x128xf32>
    %c0_23 = arith.constant 0 : index
    %c0_24 = arith.constant 0 : index
    %30 = vector.load %arg10[%c0_23, %c0_24] : memref<256x128xf32, #tpu.memory_space<vmem>>, vector<256x128xf32>
    tpu.vector_store %arg10[%c0_23, %c0_24], %29 {strides = array<i32>} : memref<256x128xf32, #tpu.memory_space<vmem>>, vector<256x128xf32>,
    return
  }
  func.func @transform_0(%arg0: i32) -> (i32, i32) {
    %c0_i32 = arith.constant 0 : i32
    %c0_i32_0 = arith.constant 0 : i32
    return %arg0, %c0_i32 : i32, i32
  }
  func.func @transform_1(%arg0: i32) -> (i32, i32) {
    %c0_i32 = arith.constant 0 : i32
    %c0_i32_0 = arith.constant 0 : i32
    %c0_i32_1 = arith.constant 0 : i32
    return %c0_i32, %c0_i32_0 : i32, i32
  }
  func.func @transform_2(%arg0: i32) -> (i32, i32) {
    %c0_i32 = arith.constant 0 : i32
    %c0_i32_0 = arith.constant 0 : i32
    %c0_i32_1 = arith.constant 0 : i32
    return %c0_i32, %c0_i32_0 : i32, i32
  }
  func.func @transform_3(%arg0: i32) -> (i32, i32) {
    %c0_i32 = arith.constant 0 : i32
    %c0_i32_0 = arith.constant 0 : i32
    %c0_i32_1 = arith.constant 0 : i32
    return %c0_i32, %c0_i32_0 : i32, i32
  }
  func.func @transform_4(%arg0: i32) -> (i32, i32) {
    %c0_i32 = arith.constant 0 : i32
    %c0_i32_0 = arith.constant 0 : i32
    %c0_i32_1 = arith.constant 0 : i32
    return %c0_i32, %c0_i32_0 : i32, i32
  }
  func.func @transform_5(%arg0: i32) -> (i32, i32) {
    %c0_i32 = arith.constant 0 : i32
    %c0_i32_0 = arith.constant 0 : i32
    %c0_i32_1 = arith.constant 0 : i32
    return %c0_i32, %c0_i32_0 : i32, i32
  }
  func.func @transform_6(%arg0: i32) -> (i32, i32) {
    %c0_i32 = arith.constant 0 : i32
    %c0_i32_0 = arith.constant 0 : i32
    %c0_i32_1 = arith.constant 0 : i32
    return %c0_i32, %c0_i32_0 : i32, i32
  }
  func.func @transform_7(%arg0: i32) -> (i32, i32) {
    %c0_i32 = arith.constant 0 : i32
    %c0_i32_0 = arith.constant 0 : i32
    %c0_i32_1 = arith.constant 0 : i32
    return %c0_i32, %c0_i32_0 : i32, i32
  }
  func.func @transform_8(%arg0: i32) -> (i32, i32) {
    %c0_i32 = arith.constant 0 : i32
    %c0_i32_0 = arith.constant 0 : i32
    %c0_i32_1 = arith.constant 0 : i32
    return %c0_i32, %c0_i32_0 : i32, i32
  }
  func.func @transform_9(%arg0: i32) -> (i32, i32) {
    %c0_i32 = arith.constant 0 : i32
    %c0_i32_0 = arith.constant 0 : i32
    return %arg0, %c0_i32 : i32, i32
  }
}

</mosaic_0001>

<bundles_post_ra>
// kernel: cart_pole_mlp_forward.1
= control target key start
LH: loop header
LB: loop body
LE: loop exit
PB: predicated region body
PF: predicated region fallthrough
CT: control target
= control target key end

     0   :  { %s2123_s30 = smov 0   ;;  %s2448_s0 = inlined_call_operand.vmem [shape: bf16[512,128], index: 0, kind: input, shape index: {}]   ;;  %s2449_s1 = inlined_call_operand.vmem [shape: bf16[128,64], index: 1, kind: input, shape index: {}]   ;;  %s2450_s2 = inlined_call_operand.vmem [shape: f32[1,64], index: 2, kind: input, shape index: {}]   ;;  %s2451_s3 = inlined_call_operand.vmem [shape: bf16[64,128], index: 3, kind: input, shape index: {}]   ;;  %s2452_s4 = inlined_call_operand.vmem [shape: f32[1,128], index: 4, kind: input, shape index: {}]   ;;  %s2453_s5 = inlined_call_operand.vmem [shape: bf16[128,64], index: 5, kind: input, shape index: {}]   ;;  %s2454_s6 = inlined_call_operand.vmem [shape: f32[1,64], index: 6, kind: input, shape index: {}]   ;;  %s2455_s7 = inlined_call_operand.vmem [shape: bf16[64,128], index: 7, kind: input, shape index: {}]   ;;  %s2456_s8 = inlined_call_operand.vmem [shape: f32[1,128], index: 8, kind: input, shape index: {}]   ;;  %s2457_s9 = inlined_call_operand.vmem [shape: f32[512,128], index: 9, kind: output, shape index: {}]  }
   0x1 LB: > { %s1658_s10 = sadd.s32 4294967295, %s2071_s30   ;;  %p1662_p0 = scmp.ge.s32.totalorder %s2071_s30, 1  ;;  %s2071_s30 = sphi %s2123_s30, %s19_s30  }
   0x2   : > { %p288_p1 = scmp.lt.s32.totalorder %s2071_s30, 3 }
   0x4   : > { %p289_p2 = pnand %p1662_p0, %p288_p1 }
   0x5   : > { %v2025_v0 = vld [vmem:[%s2449_s1] sm:$0xff] (!%p289_p2)   ;;  %s1663_s13 = sshll.u32 (!%p289_p2), %s1658_s10, 5  ;;  %v2026_v1 = vld [vmem:[%s2449_s1 + $0x8] sm:$0xff] (!%p289_p2)   ;;  %v2027_v2 = vld [vmem:[%s2449_s1 + $0x10] sm:$0xff] (!%p289_p2)   ;;  %vm784_vm0 = vcmask (!%p289_p2), 523264  }
   0x6   : > { %292 = sbr.rel (%p289_p2) target bundleno = 978 (0x3d2), region = 56  ;;  %p325_p3 = scmp.lt.s32.totalorder (!%p289_p2), %s1663_s13, 63  ;;  %1833 = vmatprep.subr.bf16.mxu0 (!%p289_p2), %v2025_v0  ;;  %v2028_v3 = vld [vmem:[%s2449_s1 + $0x18] sm:$0xff] (!%p289_p2)   ;;  %v2029_v5 = vld [vmem:[%s2449_s1 + $0x20] sm:$0xff] (!%p289_p2)   ;;  %v2030_v6 = vld [vmem:[%s2449_s1 + $0x28] sm:$0xff] (!%p289_p2)  }
   0x7   : > { %1834 = vmatpush3.bf16.msra.mxu0 (!%p289_p2), %v2025_v0  ;;  %v2031_v7 = vld [vmem:[%s2449_s1 + $0x30] sm:$0xff] (!%p289_p2)   ;;  %v2032_v8 = vld [vmem:[%s2449_s1 + $0x38] sm:$0xff] (!%p289_p2)   ;;  %v2049_v9 = vld [vmem:[%s2451_s3] sm:$0xff] (!%p289_p2)  }
   0x8   : > { %1835 = vmatprep.subr.bf16.mxu0 (!%p289_p2), %v2026_v1  ;;  %v2050_v10 = vld [vmem:[%s2451_s3 + $0x8] sm:$0xff] (!%p289_p2)   ;;  %1881 = vmatprep.subr.bf16.mxu1 (!%p289_p2), %v2049_v9  ;;  %v2051_v26 = vld [vmem:[%s2451_s3 + $0x10] sm:$0xff] (!%p289_p2)   ;;  %v2052_v27 = vld [vmem:[%s2451_s3 + $0x18] sm:$0xff] (!%p289_p2)  }
   0x9   : > { %1882 = vmatpush3.bf16.msra.mxu1 (!%p289_p2), %v2049_v9  ;;  %v2053_v28 = vld [vmem:[%s2453_s5] sm:$0xff] (!%p289_p2)   ;;  %v2054_v47 = vld [vmem:[%s2453_s5 + $0x8] sm:$0xff] (!%p289_p2)   ;;  %v2055_v55 = vld [vmem:[%s2453_s5 + $0x10] sm:$0xff] (!%p289_p2)  }
   0xa   : > { %1883 = vmatprep.subr.bf16.mxu1 (!%p289_p2), %v2050_v10  ;;  %v2197_v29 = vld [vmem:[%s2450_s2] ss:$0 sm:$0xff] (!%p289_p2)  ;;  %v2056_v63 = vld [vmem:[%s2453_s5 + $0x18] sm:$0xff] (!%p289_p2)  }
   0xb   : > { %1836 = vmatpush3.bf16.msra.mxu0 (!%p289_p2), %v2026_v1 }
   0xc   : > { %1837 = vmatprep.subr.bf16.mxu0 (!%p289_p2), %v2027_v2 }
   0xd   : > { %s2459_s13 = smov (!%p325_p3, %s1663_s13), 63  ;;  %1884 = vmatpush3.bf16.msra.mxu1 %v2050_v10 }
   0xe   : > { %s1664_s18 = sshll.u32 %s2459_s13, 2  ;;  %1885 = vmatprep.subr.bf16.mxu1 %v2051_v26  ;;  %s1666_s12 = sshll.u32 %s2459_s13, 3 }
   0xf   : > { %s2146_s21 = scalar_lea.vmem %s2448_s0, %s1664_s18  ;;  %1838 = vmatpush3.bf16.msra.mxu0 %v2027_v2  ;;  %s2379_s18 = scalar_lea.vmem %s2457_s9, %s1666_s12 }
  0x10   : > { %v2033_v4 = vld [vmem:[%s2146_s21] sm:$0xff]   ;;  %1839 = vmatprep.subr.bf16.mxu0 %v2028_v3  ;;  %v2034_v11 = vld [vmem:[%s2146_s21 + $0x8] sm:$0xff]   ;;  %v2035_v12 = vld [vmem:[%s2146_s21 + $0x10] sm:$0xff]  }
  0x11   : > { %1849 = vmatprep.mubr.bf16.mxu0 %v2033_v4  ;;  %v2036_v13 = vld [vmem:[%s2146_s21 + $0x18] sm:$0xff]   ;;  %v2037_v14 = vld [vmem:[%s2146_s21 + $0x20] sm:$0xff]   ;;  %v2038_v15 = vld [vmem:[%s2146_s21 + $0x28] sm:$0xff]   ;;  %1886 = vmatpush3.bf16.msra.mxu1 %v2051_v26 }
  0x12   : > { %v2039_v16 = vld [vmem:[%s2146_s21 + $0x30] sm:$0xff]   ;;  %v2040_v17 = vld [vmem:[%s2146_s21 + $0x38] sm:$0xff]   ;;  %v2041_v18 = vld [vmem:[%s2146_s21 + $0x40] sm:$0xff]   ;;  %1887 = vmatprep.subr.bf16.mxu1 %v2052_v27 }
  0x13   : > { %1840 = vmatpush3.bf16.msra.mxu0 %v2028_v3  ;;  %v2042_v19 = vld [vmem:[%s2146_s21 + $0x48] sm:$0xff]   ;;  %v2043_v20 = vld [vmem:[%s2146_s21 + $0x50] sm:$0xff]   ;;  %v2044_v21 = vld [vmem:[%s2146_s21 + $0x58] sm:$0xff]  }
  0x14   : > { %1841 = vmatprep.subr.bf16.mxu0 %v2029_v5  ;;  %v2045_v22 = vld [vmem:[%s2146_s21 + $0x60] sm:$0xff]   ;;  %v2046_v23 = vld [vmem:[%s2146_s21 + $0x68] sm:$0xff]   ;;  %v2047_v24 = vld [vmem:[%s2146_s21 + $0x70] sm:$0xff]  }
  0x15   : > { %v2048_v25 = vld [vmem:[%s2146_s21 + $0x78] sm:$0xff]   ;;  %1888 = vmatpush3.bf16.msra.mxu1 %v2052_v27 }
  0x16   : > { %1921 = vmatprep.subr.bf16.mxu1 %v2053_v28 }
  0x17   : > { %1842 = vmatpush3.bf16.msra.mxu0 %v2029_v5 }
  0x18   : > { %1843 = vmatprep.subr.bf16.mxu0 %v2030_v6 }
  0x1b   : > { %1844 = vmatpush3.bf16.msra.mxu0 %v2030_v6 }
  0x1c   : > { %1845 = vmatprep.subr.bf16.mxu0 %v2031_v7 }
  0x1f   : > { %1846 = vmatpush3.bf16.msra.mxu0 %v2031_v7  ;;  %v2057_v7 = vld [vmem:[%s2453_s5 + $0x20] sm:$0xff]  }
  0x20   : > { %1847 = vmatprep.subr.bf16.mxu0 %v2032_v8 }
  0x23   : > { %1848 = vmatpush3.bf16.msra.mxu0 %v2032_v8 }
  0x26   : > { %1850 = vmatmul.mubr.bf16.vlgmr.msra.gmra.mrb[0].mxu0 %v2034_v11 }
  0x27   : > { %1853 = vmatprep.mubr.bf16.mxu0 %v2035_v12 }
  0x2e   : > { %1854 = vmatmul.mubr.bf16.gmra.mrb[4].mxu0 %v2036_v13 }
  0x2f   : > { %1857 = vmatprep.mubr.bf16.mxu0 %v2037_v14 }
  0x36   : > { %1858 = vmatmul.mubr.bf16.gmra.mrb[8].mxu0 %v2038_v15  ;;  %v2058_v15 = vld [vmem:[%s2453_s5 + $0x28] sm:$0xff]  }
  0x37   : > { %1861 = vmatprep.mubr.bf16.mxu0 %v2039_v16 }
  0x3e   : > { %1862 = vmatmul.mubr.bf16.gmra.mrb[12].mxu0 %v2040_v17 }
  0x3f   : > { %1865 = vmatprep.mubr.bf16.mxu0 %v2041_v18 }
  0x46   : > { %1866 = vmatmul.mubr.bf16.gmra.mrb[16].mxu0 %v2042_v19 }
  0x47   : > { %1869 = vmatprep.mubr.bf16.mxu0 %v2043_v20 }
  0x4e   : > { %1870 = vmatmul.mubr.bf16.gmra.mrb[20].mxu0 %v2044_v21 }
  0x4f   : > { %1873 = vmatprep.mubr.bf16.mxu0 %v2045_v22 }
  0x56   : > { %1874 = vmatmul.mubr.bf16.gmra.mrb[24].mxu0 %v2046_v23  ;;  %v2059_v23 = vld [vmem:[%s2453_s5 + $0x30] sm:$0xff]  }
  0x57   : > { %1877 = vmatprep.mubr.bf16.mxu0 %v2047_v24 }
  0x5e   : > { %1878 = vmatmul.mubr.bf16.gmra.mrb[28].mxu0 %v2048_v25 }
  0xf9   : > { %v1851_v30 = vpop.f32.mrb[0].mxu0 }
  0xfa   : > { %v579_v31 = vadd.f32 %v1851_v30, %v2197_v29  ;;  %v570_v32 = vpop.f32.mrb[1].mxu0 }
  0xfb   : > { %v571_v33 = vadd.f32 %v2197_v29, %v570_v32  ;;  %v1852_v34 = vpop.f32.mrb[2].mxu0 }
  0xfc   : > { %v582_v35 = vadd.f32 %v1852_v34, %v2197_v29  ;;  %v573_v36 = vpop.f32.mrb[3].mxu0  ;;  %v699_v38 = vmax.f32 %v579_v31, 0.0 }
  0xfd   : > { %v574_v37 = vadd.f32 %v2197_v29, %v573_v36  ;;  %v697_v40 = vmax.f32 %v571_v33, 0.0 }
  0xfe   : > { %v700_v39 = vmax.f32 %v582_v35, 0.0 }
  0xff   : > { %v698_v41 = vmax.f32 %v574_v37, 0.0 }
 0x100   : > { %v730_v42 = vpack.c.bf16 %v700_v39, %v699_v38 }
 0x101   : > { %v1855_v43 = vpop.f32.mrb[4].mxu0  ;;  %v729_v44 = vpack.c.bf16 %v698_v41, %v697_v40 }
 0x102   : > { %v595_v45 = vadd.f32 %v1855_v43, %v2197_v29  ;;  %v586_v46 = vpop.f32.mrb[5].mxu0 }
 0x103   : > { %v587_v48 = vadd.f32 %v2197_v29, %v586_v46  ;;  %v1856_v49 = vpop.f32.mrb[6].mxu0  ;;  %1889 = vmatprep.mubr.msk.bf16.mxu1 %vm784_vm0, %v729_v44 }
 0x104   : > { %v598_v50 = vadd.f32 %v1856_v49, %v2197_v29  ;;  %v589_v51 = vpop.f32.mrb[7].mxu0  ;;  %1890 = vmatmul.mubr.msk.bf16.vlgmr.msra.gmra.mrb[0].mxu1 %vm784_vm0, %v730_v42  ;;  %v703_v53 = vmax.f32 %v595_v45, 0.0 }
 0x105   : > { %v590_v52 = vadd.f32 %v2197_v29, %v589_v51  ;;  %1922 = vmatpush3.bf16.msra.mxu1 %v2053_v28  ;;  %v701_v56 = vmax.f32 %v587_v48, 0.0 }
 0x106   : > { %v704_v54 = vmax.f32 %v598_v50, 0.0  ;;  %1923 = vmatprep.subr.bf16.mxu1 %v2054_v47 }
 0x107   : > { %v702_v57 = vmax.f32 %v590_v52, 0.0 }
 0x108   : > { %v732_v58 = vpack.c.bf16 %v704_v54, %v703_v53 }
 0x109   : > { %v731_v59 = vpack.c.bf16 %v702_v57, %v701_v56  ;;  %v1859_v60 = vpop.f32.mrb[8].mxu0  ;;  %1924 = vmatpush3.bf16.msra.mxu1 %v2054_v47 }
 0x10a   : > { %v611_v61 = vadd.f32 %v1859_v60, %v2197_v29  ;;  %v602_v62 = vpop.f32.mrb[9].mxu0  ;;  %1925 = vmatprep.subr.bf16.mxu1 %v2055_v55 }
 0x10b   : > { %v603_v0 = vadd.f32 %v2197_v29, %v602_v62  ;;  %v1860_v1 = vpop.f32.mrb[10].mxu0  ;;  %1893 = vmatprep.mubr.msk.bf16.mxu1 %vm784_vm0, %v731_v59 }
 0x10c   : > { %v614_v2 = vadd.f32 %v1860_v1, %v2197_v29  ;;  %v605_v3 = vpop.f32.mrb[11].mxu0  ;;  %1894 = vmatmul.mubr.msk.bf16.gmra.mrb[4].mxu1 %vm784_vm0, %v732_v58  ;;  %v707_v5 = vmax.f32 %v611_v61, 0.0 }
 0x10d   : > { %v606_v4 = vadd.f32 %v2197_v29, %v605_v3  ;;  %1926 = vmatpush3.bf16.msra.mxu1 %v2055_v55  ;;  %v705_v8 = vmax.f32 %v603_v0, 0.0 }
 0x10e   : > { %v708_v6 = vmax.f32 %v614_v2, 0.0  ;;  %1927 = vmatprep.subr.bf16.mxu1 %v2056_v63 }
 0x10f   : > { %v706_v9 = vmax.f32 %v606_v4, 0.0 }
 0x110   : > { %v734_v10 = vpack.c.bf16 %v708_v6, %v707_v5 }
 0x111   : > { %v733_v11 = vpack.c.bf16 %v706_v9, %v705_v8  ;;  %v1863_v12 = vpop.f32.mrb[12].mxu0  ;;  %1928 = vmatpush3.bf16.msra.mxu1 %v2056_v63 }
 0x112   : > { %v627_v13 = vadd.f32 %v1863_v12, %v2197_v29  ;;  %v618_v14 = vpop.f32.mrb[13].mxu0  ;;  %1929 = vmatprep.subr.bf16.mxu1 %v2057_v7 }
 0x113   : > { %v619_v16 = vadd.f32 %v2197_v29, %v618_v14  ;;  %v1864_v17 = vpop.f32.mrb[14].mxu0  ;;  %1897 = vmatprep.mubr.msk.bf16.mxu1 %vm784_vm0, %v733_v11 }
 0x114   : > { %v630_v18 = vadd.f32 %v1864_v17, %v2197_v29  ;;  %v621_v19 = vpop.f32.mrb[15].mxu0  ;;  %1898 = vmatmul.mubr.msk.bf16.gmra.mrb[8].mxu1 %vm784_vm0, %v734_v10  ;;  %v711_v21 = vmax.f32 %v627_v13, 0.0 }
 0x115   : > { %v622_v20 = vadd.f32 %v2197_v29, %v621_v19  ;;  %1930 = vmatpush3.bf16.msra.mxu1 %v2057_v7  ;;  %v709_v24 = vmax.f32 %v619_v16, 0.0 }
 0x116   : > { %v712_v22 = vmax.f32 %v630_v18, 0.0  ;;  %1931 = vmatprep.subr.bf16.mxu1 %v2058_v15 }
 0x117   : > { %v710_v25 = vmax.f32 %v622_v20, 0.0 }
 0x118   : > { %v736_v26 = vpack.c.bf16 %v712_v22, %v711_v21  ;;  %v2060_v21 = vld [vmem:[%s2453_s5 + $0x38] sm:$0xff]   ;;  %v2062_v22 = vld [vmem:[%s2455_s7 + $0x8] sm:$0xff]  }
 0x119   : > { %v735_v27 = vpack.c.bf16 %v710_v25, %v709_v24  ;;  %v1867_v28 = vpop.f32.mrb[16].mxu0  ;;  %1932 = vmatpush3.bf16.msra.mxu1 %v2058_v15  ;;  %v2280_v24 = vld [vmem:[%s2452_s4] ss:$0 sm:$0xff] }
 0x11a   : > { %v643_v30 = vadd.f32 %v1867_v28, %v2197_v29  ;;  %v634_v31 = vpop.f32.mrb[17].mxu0  ;;  %1933 = vmatprep.subr.bf16.mxu1 %v2059_v23 }
 0x11b   : > { %v635_v32 = vadd.f32 %v2197_v29, %v634_v31  ;;  %v1868_v33 = vpop.f32.mrb[18].mxu0  ;;  %1901 = vmatprep.mubr.msk.bf16.mxu1 %vm784_vm0, %v735_v27 }
 0x11c   : > { %v646_v34 = vadd.f32 %v1868_v33, %v2197_v29  ;;  %v637_v35 = vpop.f32.mrb[19].mxu0  ;;  %1902 = vmatmul.mubr.msk.bf16.gmra.mrb[12].mxu1 %vm784_vm0, %v736_v26  ;;  %v715_v37 = vmax.f32 %v643_v30, 0.0 }
 0x11d   : > { %v638_v36 = vadd.f32 %v2197_v29, %v637_v35  ;;  %1934 = vmatpush3.bf16.msra.mxu1 %v2059_v23  ;;  %v713_v39 = vmax.f32 %v635_v32, 0.0  ;;  %v2063_v23 = vld [vmem:[%s2455_s7 + $0x10] sm:$0xff]  }
 0x11e   : > { %v716_v38 = vmax.f32 %v646_v34, 0.0  ;;  %1935 = vmatprep.subr.bf16.mxu1 %v2060_v21 }
 0x11f   : > { %v714_v40 = vmax.f32 %v638_v36, 0.0 }
 0x120   : > { %v738_v41 = vpack.c.bf16 %v716_v38, %v715_v37 }
 0x121   : > { %v737_v42 = vpack.c.bf16 %v714_v40, %v713_v39  ;;  %v1871_v43 = vpop.f32.mrb[20].mxu0  ;;  %1936 = vmatpush3.bf16.msra.mxu1 %v2060_v21 }
 0x122   : > { %v659_v44 = vadd.f32 %v1871_v43, %v2197_v29  ;;  %v650_v45 = vpop.f32.mrb[21].mxu0 }
 0x123   : > { %v651_v46 = vadd.f32 %v2197_v29, %v650_v45  ;;  %v1872_v47 = vpop.f32.mrb[22].mxu0  ;;  %1905 = vmatprep.mubr.msk.bf16.mxu1 %vm784_vm0, %v737_v42 }
 0x124   : > { %v662_v48 = vadd.f32 %v1872_v47, %v2197_v29  ;;  %v653_v49 = vpop.f32.mrb[23].mxu0  ;;  %1906 = vmatmul.mubr.msk.bf16.gmra.mrb[16].mxu1 %vm784_vm0, %v738_v41  ;;  %v719_v51 = vmax.f32 %v659_v44, 0.0 }
 0x125   : > { %v654_v50 = vadd.f32 %v2197_v29, %v653_v49  ;;  %v717_v53 = vmax.f32 %v651_v46, 0.0 }
 0x126   : > { %v720_v52 = vmax.f32 %v662_v48, 0.0 }
 0x127   : > { %v718_v54 = vmax.f32 %v654_v50, 0.0 }
 0x128   : > { %v740_v55 = vpack.c.bf16 %v720_v52, %v719_v51 }
 0x129   : > { %v739_v56 = vpack.c.bf16 %v718_v54, %v717_v53  ;;  %v1875_v57 = vpop.f32.mrb[24].mxu0 }
 0x12a   : > { %v675_v58 = vadd.f32 %v1875_v57, %v2197_v29  ;;  %v666_v59 = vpop.f32.mrb[25].mxu0 }
 0x12b   : > { %v667_v60 = vadd.f32 %v2197_v29, %v666_v59  ;;  %v1876_v61 = vpop.f32.mrb[26].mxu0  ;;  %1909 = vmatprep.mubr.msk.bf16.mxu1 %vm784_vm0, %v739_v56 }
 0x12c   : > { %v678_v62 = vadd.f32 %v1876_v61, %v2197_v29  ;;  %v669_v63 = vpop.f32.mrb[27].mxu0  ;;  %1910 = vmatmul.mubr.msk.bf16.gmra.mrb[20].mxu1 %vm784_vm0, %v740_v55  ;;  %v723_v1 = vmax.f32 %v675_v58, 0.0 }
 0x12d   : > { %v670_v0 = vadd.f32 %v2197_v29, %v669_v63  ;;  %v721_v3 = vmax.f32 %v667_v60, 0.0 }
 0x12e   : > { %v724_v2 = vmax.f32 %v678_v62, 0.0 }
 0x12f   : > { %v722_v4 = vmax.f32 %v670_v0, 0.0 }
 0x130   : > { %v742_v5 = vpack.c.bf16 %v724_v2, %v723_v1 }
 0x131   : > { %v741_v6 = vpack.c.bf16 %v722_v4, %v721_v3  ;;  %v1879_v7 = vpop.f32.mrb[28].mxu0 }
 0x132   : > { %v691_v8 = vadd.f32 %v1879_v7, %v2197_v29  ;;  %v682_v9 = vpop.f32.mrb[29].mxu0 }
 0x133   : > { %v683_v10 = vadd.f32 %v2197_v29, %v682_v9  ;;  %v1880_v11 = vpop.f32.mrb[30].mxu0  ;;  %1913 = vmatprep.mubr.msk.bf16.mxu1 %vm784_vm0, %v741_v6 }
 0x134   : > { %v694_v12 = vadd.f32 %v1880_v11, %v2197_v29  ;;  %v685_v13 = vpop.f32.mrb[31].mxu0  ;;  %1914 = vmatmul.mubr.msk.bf16.gmra.mrb[24].mxu1 %vm784_vm0, %v742_v5  ;;  %v727_v15 = vmax.f32 %v691_v8, 0.0 }
 0x135   : > { %v686_v14 = vadd.f32 %v2197_v29, %v685_v13  ;;  %v725_v17 = vmax.f32 %v683_v10, 0.0  ;;  %v2061_v29 = vld [vmem:[%s2455_s7] sm:$0xff]  }
 0x136   : > { %v728_v16 = vmax.f32 %v694_v12, 0.0  ;;  %1969 = vmatprep.subr.bf16.mxu0 %v2061_v29  ;;  %2009 = vmatprep.subr.bf16.mxu1 %v2061_v29 }
 0x137   : > { %v726_v18 = vmax.f32 %v686_v14, 0.0  ;;  %1970 = vmatpush3.bf16.msra.mxu0 %v2061_v29 }
 0x138   : > { %v744_v19 = vpack.c.bf16 %v728_v16, %v727_v15  ;;  %1971 = vmatprep.subr.bf16.mxu0 %v2062_v22 }
 0x139   : > { %v743_v20 = vpack.c.bf16 %v726_v18, %v725_v17 }
 0x13b   : > { %1917 = vmatprep.mubr.msk.bf16.mxu1 %vm784_vm0, %v743_v20  ;;  %1972 = vmatpush3.bf16.msra.mxu0 %v2062_v22 }
 0x13c   : > { %1918 = vmatmul.mubr.msk.bf16.gmra.mrb[28].mxu1 %vm784_vm0, %v744_v19  ;;  %1973 = vmatprep.subr.bf16.mxu0 %v2063_v23 }
 0x13f   : > { %1974 = vmatpush3.bf16.msra.mxu0 %v2063_v23 }
 0x1d7   : > { %v1891_v25 = vpop.f32.mrb[0].mxu1 }
 0x1d8   : > { %v876_v26 = vadd.f32 %v1891_v25, %v2280_v24  ;;  %v867_v27 = vpop.f32.mrb[1].mxu1 }
 0x1d9   : > { %v868_v28 = vadd.f32 %v2280_v24, %v867_v27  ;;  %v1892_v30 = vpop.f32.mrb[2].mxu1 }
 0x1da   : > { %v879_v31 = vadd.f32 %v1892_v30, %v2280_v24  ;;  %v870_v32 = vpop.f32.mrb[3].mxu1  ;;  %v996_v34 = vmax.f32 %v876_v26, 0.0 }
 0x1db   : > { %v871_v33 = vadd.f32 %v2280_v24, %v870_v32  ;;  %v994_v36 = vmax.f32 %v868_v28, 0.0 }
 0x1dc   : > { %v997_v35 = vmax.f32 %v879_v31, 0.0 }
 0x1dd   : > { %v995_v37 = vmax.f32 %v871_v33, 0.0 }
 0x1de   : > { %v1027_v38 = vpack.c.bf16 %v997_v35, %v996_v34 }
 0x1df   : > { %v1026_v39 = vpack.c.bf16 %v995_v37, %v994_v36  ;;  %v1895_v40 = vpop.f32.mrb[4].mxu1 }
 0x1e0   : > { %v892_v41 = vadd.f32 %v1895_v40, %v2280_v24  ;;  %v883_v42 = vpop.f32.mrb[5].mxu1 }
 0x1e1   : > { %v884_v43 = vadd.f32 %v2280_v24, %v883_v42  ;;  %v1896_v44 = vpop.f32.mrb[6].mxu1  ;;  %1937 = vmatprep.mubr.bf16.mxu1 %v1026_v39 }
 0x1e2   : > { %v895_v45 = vadd.f32 %v1896_v44, %v2280_v24  ;;  %v886_v46 = vpop.f32.mrb[7].mxu1  ;;  %1938 = vmatmul.mubr.bf16.vlgmr.msra.gmra.mrb[32].mxu1 %v1027_v38  ;;  %v1000_v48 = vmax.f32 %v892_v41, 0.0 }
 0x1e3   : > { %v887_v47 = vadd.f32 %v2280_v24, %v886_v46  ;;  %2013 = vmatpush3.bf16.msra.mxu1 %v2061_v29  ;;  %v998_v50 = vmax.f32 %v884_v43, 0.0 }
 0x1e4   : > { %v1001_v49 = vmax.f32 %v895_v45, 0.0  ;;  %2010 = vmatprep.subr.bf16.mxu1 %v2062_v22 }
 0x1e5   : > { %v999_v51 = vmax.f32 %v887_v47, 0.0 }
 0x1e6   : > { %v1029_v52 = vpack.c.bf16 %v1001_v49, %v1000_v48 }
 0x1e7   : > { %v1028_v53 = vpack.c.bf16 %v999_v51, %v998_v50  ;;  %v1899_v54 = vpop.f32.mrb[8].mxu1  ;;  %2014 = vmatpush3.bf16.msra.mxu1 %v2062_v22 }
 0x1e8   : > { %v908_v55 = vadd.f32 %v1899_v54, %v2280_v24  ;;  %v899_v56 = vpop.f32.mrb[9].mxu1  ;;  %2011 = vmatprep.subr.bf16.mxu1 %v2063_v23 }
 0x1e9   : > { %v900_v57 = vadd.f32 %v2280_v24, %v899_v56  ;;  %v1900_v58 = vpop.f32.mrb[10].mxu1  ;;  %1941 = vmatprep.mubr.bf16.mxu1 %v1028_v53 }
 0x1ea   : > { %v911_v59 = vadd.f32 %v1900_v58, %v2280_v24  ;;  %v902_v60 = vpop.f32.mrb[11].mxu1  ;;  %1942 = vmatmul.mubr.bf16.gmra.mrb[36].mxu1 %v1029_v52  ;;  %v1004_v62 = vmax.f32 %v908_v55, 0.0 }
 0x1eb   : > { %v903_v61 = vadd.f32 %v2280_v24, %v902_v60  ;;  %2015 = vmatpush3.bf16.msra.mxu1 %v2063_v23  ;;  %v1002_v0 = vmax.f32 %v900_v57, 0.0 }
 0x1ec   : > { %v1005_v63 = vmax.f32 %v911_v59, 0.0 }
 0x1ed   : > { %v1003_v1 = vmax.f32 %v903_v61, 0.0 }
 0x1ee   : > { %v1031_v2 = vpack.c.bf16 %v1005_v63, %v1004_v62 }
 0x1ef   : > { %v1030_v3 = vpack.c.bf16 %v1003_v1, %v1002_v0  ;;  %v1903_v4 = vpop.f32.mrb[12].mxu1 }
 0x1f0   : > { %v924_v5 = vadd.f32 %v1903_v4, %v2280_v24  ;;  %v915_v6 = vpop.f32.mrb[13].mxu1 }
 0x1f1   : > { %v916_v7 = vadd.f32 %v2280_v24, %v915_v6  ;;  %v1904_v8 = vpop.f32.mrb[14].mxu1  ;;  %1945 = vmatprep.mubr.bf16.mxu1 %v1030_v3 }
 0x1f2   : > { %v927_v9 = vadd.f32 %v1904_v8, %v2280_v24  ;;  %v918_v10 = vpop.f32.mrb[15].mxu1  ;;  %1946 = vmatmul.mubr.bf16.gmra.mrb[40].mxu1 %v1031_v2  ;;  %v1008_v12 = vmax.f32 %v924_v5, 0.0 }
 0x1f3   : > { %v919_v11 = vadd.f32 %v2280_v24, %v918_v10  ;;  %v1006_v14 = vmax.f32 %v916_v7, 0.0 }
 0x1f4   : > { %v1009_v13 = vmax.f32 %v927_v9, 0.0 }
 0x1f5   : > { %v1007_v15 = vmax.f32 %v919_v11, 0.0  ;;  %v2064_v11 = vld [vmem:[%s2455_s7 + $0x18] sm:$0xff]  }
 0x1f6   : > { %v1033_v16 = vpack.c.bf16 %v1009_v13, %v1008_v12  ;;  %1975 = vmatprep.subr.bf16.mxu0 %v2064_v11  ;;  %2012 = vmatprep.subr.bf16.mxu1 %v2064_v11 }
 0x1f7   : > { %v1032_v17 = vpack.c.bf16 %v1007_v15, %v1006_v14  ;;  %v1907_v18 = vpop.f32.mrb[16].mxu1  ;;  %1976 = vmatpush3.bf16.msra.mxu0 %v2064_v11  ;;  %2016 = vmatpush3.bf16.msra.mxu1 %v2064_v11 }
 0x1f8   : > { %v940_v19 = vadd.f32 %v1907_v18, %v2280_v24  ;;  %v931_v20 = vpop.f32.mrb[17].mxu1 }
 0x1f9   : > { %v932_v21 = vadd.f32 %v2280_v24, %v931_v20  ;;  %v1908_v29 = vpop.f32.mrb[18].mxu1  ;;  %1949 = vmatprep.mubr.bf16.mxu1 %v1032_v17 }
 0x1fa   : > { %v943_v22 = vadd.f32 %v1908_v29, %v2280_v24  ;;  %v934_v23 = vpop.f32.mrb[19].mxu1  ;;  %1950 = vmatmul.mubr.bf16.gmra.mrb[44].mxu1 %v1033_v16  ;;  %v1012_v26 = vmax.f32 %v940_v19, 0.0 }
 0x1fb   : > { %v935_v25 = vadd.f32 %v2280_v24, %v934_v23  ;;  %v1010_v28 = vmax.f32 %v932_v21, 0.0 }
 0x1fc   : > { %v1013_v27 = vmax.f32 %v943_v22, 0.0 }
 0x1fd   : > { %v1011_v30 = vmax.f32 %v935_v25, 0.0 }
 0x1fe   : > { %v1035_v31 = vpack.c.bf16 %v1013_v27, %v1012_v26 }
 0x1ff   : > { %v1034_v32 = vpack.c.bf16 %v1011_v30, %v1010_v28  ;;  %v1911_v33 = vpop.f32.mrb[20].mxu1 }
 0x200   : > { %v956_v34 = vadd.f32 %v1911_v33, %v2280_v24  ;;  %v947_v35 = vpop.f32.mrb[21].mxu1 }
 0x201   : > { %v948_v36 = vadd.f32 %v2280_v24, %v947_v35  ;;  %v1912_v37 = vpop.f32.mrb[22].mxu1  ;;  %1953 = vmatprep.mubr.bf16.mxu1 %v1034_v32 }
 0x202   : > { %v959_v38 = vadd.f32 %v1912_v37, %v2280_v24  ;;  %v950_v39 = vpop.f32.mrb[23].mxu1  ;;  %1954 = vmatmul.mubr.bf16.gmra.mrb[48].mxu1 %v1035_v31  ;;  %v1016_v41 = vmax.f32 %v956_v34, 0.0 }
 0x203   : > { %v951_v40 = vadd.f32 %v2280_v24, %v950_v39  ;;  %v1014_v43 = vmax.f32 %v948_v36, 0.0 }
 0x204   : > { %v1017_v42 = vmax.f32 %v959_v38, 0.0 }
 0x205   : > { %v1015_v44 = vmax.f32 %v951_v40, 0.0 }
 0x206   : > { %v1037_v45 = vpack.c.bf16 %v1017_v42, %v1016_v41 }
 0x207   : > { %v1036_v46 = vpack.c.bf16 %v1015_v44, %v1014_v43  ;;  %v1915_v47 = vpop.f32.mrb[24].mxu1 }
 0x208   : > { %v972_v48 = vadd.f32 %v1915_v47, %v2280_v24  ;;  %v963_v49 = vpop.f32.mrb[25].mxu1 }
 0x209   : > { %v964_v50 = vadd.f32 %v2280_v24, %v963_v49  ;;  %v1916_v51 = vpop.f32.mrb[26].mxu1  ;;  %1957 = vmatprep.mubr.bf16.mxu1 %v1036_v46 }
 0x20a   : > { %v975_v52 = vadd.f32 %v1916_v51, %v2280_v24  ;;  %v966_v53 = vpop.f32.mrb[27].mxu1  ;;  %1958 = vmatmul.mubr.bf16.gmra.mrb[52].mxu1 %v1037_v45  ;;  %v1020_v55 = vmax.f32 %v972_v48, 0.0 }
 0x20b   : > { %v967_v54 = vadd.f32 %v2280_v24, %v966_v53  ;;  %v1018_v57 = vmax.f32 %v964_v50, 0.0 }
 0x20c   : > { %v1021_v56 = vmax.f32 %v975_v52, 0.0 }
 0x20d   : > { %v1019_v58 = vmax.f32 %v967_v54, 0.0 }
 0x20e   : > { %v1039_v59 = vpack.c.bf16 %v1021_v56, %v1020_v55 }
 0x20f   : > { %v1038_v60 = vpack.c.bf16 %v1019_v58, %v1018_v57  ;;  %v1919_v61 = vpop.f32.mrb[28].mxu1 }
 0x210   : > { %v988_v62 = vadd.f32 %v1919_v61, %v2280_v24  ;;  %v979_v63 = vpop.f32.mrb[29].mxu1 }
 0x211   : > { %v980_v0 = vadd.f32 %v2280_v24, %v979_v63  ;;  %v1920_v1 = vpop.f32.mrb[30].mxu1  ;;  %1961 = vmatprep.mubr.bf16.mxu1 %v1038_v60 }
 0x212   : > { %v991_v2 = vadd.f32 %v1920_v1, %v2280_v24  ;;  %v982_v3 = vpop.f32.mrb[31].mxu1  ;;  %1962 = vmatmul.mubr.bf16.gmra.mrb[56].mxu1 %v1039_v59  ;;  %v1024_v5 = vmax.f32 %v988_v62, 0.0 }
 0x213   : > { %v983_v4 = vadd.f32 %v2280_v24, %v982_v3  ;;  %v1022_v7 = vmax.f32 %v980_v0, 0.0  ;;  %v2320_v24 = vld [vmem:[%s2454_s6] ss:$0 sm:$0xff] }
 0x214   : > { %v1025_v6 = vmax.f32 %v991_v2, 0.0 }
 0x215   : > { %v1023_v8 = vmax.f32 %v983_v4, 0.0 }
 0x216   : > { %v1041_v9 = vpack.c.bf16 %v1025_v6, %v1024_v5 }
 0x217   : > { %v1040_v10 = vpack.c.bf16 %v1023_v8, %v1022_v7 }
 0x219   : > { %1965 = vmatprep.mubr.bf16.mxu1 %v1040_v10 }
 0x21a   : > { %1966 = vmatmul.mubr.bf16.gmra.mrb[60].mxu1 %v1041_v9 }
 0x2b5   : > { %v1939_v12 = vpop.f32.mrb[32].mxu1 }
 0x2b6   : > { %v1156_v13 = vadd.f32 %v1939_v12, %v2320_v24  ;;  %v1147_v14 = vpop.f32.mrb[33].mxu1 }
 0x2b7   : > { %v1148_v15 = vadd.f32 %v2320_v24, %v1147_v14  ;;  %v1940_v16 = vpop.f32.mrb[34].mxu1 }
 0x2b8   : > { %v1159_v17 = vadd.f32 %v1940_v16, %v2320_v24  ;;  %v1150_v18 = vpop.f32.mrb[35].mxu1  ;;  %v1276_v20 = vmax.f32 %v1156_v13, 0.0 }
 0x2b9   : > { %v1151_v19 = vadd.f32 %v2320_v24, %v1150_v18  ;;  %v1274_v29 = vmax.f32 %v1148_v15, 0.0 }
 0x2ba   : > { %v1277_v21 = vmax.f32 %v1159_v17, 0.0 }
 0x2bb   : > { %v1275_v22 = vmax.f32 %v1151_v19, 0.0 }
 0x2bc   : > { %v1307_v23 = vpack.c.bf16 %v1277_v21, %v1276_v20 }
 0x2bd   : > { %v1306_v25 = vpack.c.bf16 %v1275_v22, %v1274_v29  ;;  %v1943_v26 = vpop.f32.mrb[36].mxu1 }
 0x2be   : > { %v1172_v27 = vadd.f32 %v1943_v26, %v2320_v24  ;;  %v1163_v28 = vpop.f32.mrb[37].mxu1 }
 0x2bf   : > { %v1164_v30 = vadd.f32 %v2320_v24, %v1163_v28  ;;  %v1944_v31 = vpop.f32.mrb[38].mxu1  ;;  %1977 = vmatprep.mubr.msk.bf16.mxu0 %vm784_vm0, %v1306_v25 }
 0x2c0   : > { %v1175_v32 = vadd.f32 %v1944_v31, %v2320_v24  ;;  %v1166_v33 = vpop.f32.mrb[39].mxu1  ;;  %1978 = vmatmul.mubr.msk.bf16.vlgmr.msra.gmra.mrb[32].mxu0 %vm784_vm0, %v1307_v23  ;;  %v1280_v35 = vmax.f32 %v1172_v27, 0.0 }
 0x2c1   : > { %v1167_v34 = vadd.f32 %v2320_v24, %v1166_v33  ;;  %v1278_v37 = vmax.f32 %v1164_v30, 0.0 }
 0x2c2   : > { %v1281_v36 = vmax.f32 %v1175_v32, 0.0 }
 0x2c3   : > { %v1279_v38 = vmax.f32 %v1167_v34, 0.0 }
 0x2c4   : > { %v1309_v39 = vpack.c.bf16 %v1281_v36, %v1280_v35 }
 0x2c5   : > { %v1308_v40 = vpack.c.bf16 %v1279_v38, %v1278_v37  ;;  %v1947_v41 = vpop.f32.mrb[40].mxu1 }
 0x2c6   : > { %v1188_v42 = vadd.f32 %v1947_v41, %v2320_v24  ;;  %v1179_v43 = vpop.f32.mrb[41].mxu1 }
 0x2c7   : > { %v1180_v44 = vadd.f32 %v2320_v24, %v1179_v43  ;;  %v1948_v45 = vpop.f32.mrb[42].mxu1  ;;  %1981 = vmatprep.mubr.msk.bf16.mxu0 %vm784_vm0, %v1308_v40 }
 0x2c8   : > { %v1191_v46 = vadd.f32 %v1948_v45, %v2320_v24  ;;  %v1182_v47 = vpop.f32.mrb[43].mxu1  ;;  %1982 = vmatmul.mubr.msk.bf16.gmra.mrb[36].mxu0 %vm784_vm0, %v1309_v39  ;;  %v1284_v49 = vmax.f32 %v1188_v42, 0.0 }
 0x2c9   : > { %v1183_v48 = vadd.f32 %v2320_v24, %v1182_v47  ;;  %v1282_v51 = vmax.f32 %v1180_v44, 0.0 }
 0x2ca   : > { %v1285_v50 = vmax.f32 %v1191_v46, 0.0 }
 0x2cb   : > { %v1283_v52 = vmax.f32 %v1183_v48, 0.0 }
 0x2cc   : > { %v1311_v53 = vpack.c.bf16 %v1285_v50, %v1284_v49 }
 0x2cd   : > { %v1310_v54 = vpack.c.bf16 %v1283_v52, %v1282_v51  ;;  %v1951_v55 = vpop.f32.mrb[44].mxu1 }
 0x2ce   : > { %v1204_v56 = vadd.f32 %v1951_v55, %v2320_v24  ;;  %v1195_v57 = vpop.f32.mrb[45].mxu1 }
 0x2cf   : > { %v1196_v58 = vadd.f32 %v2320_v24, %v1195_v57  ;;  %v1952_v59 = vpop.f32.mrb[46].mxu1  ;;  %1985 = vmatprep.mubr.msk.bf16.mxu0 %vm784_vm0, %v1310_v54 }
 0x2d0   : > { %v1207_v60 = vadd.f32 %v1952_v59, %v2320_v24  ;;  %v1198_v61 = vpop.f32.mrb[47].mxu1  ;;  %1986 = vmatmul.mubr.msk.bf16.gmra.mrb[40].mxu0 %vm784_vm0, %v1311_v53  ;;  %v1288_v63 = vmax.f32 %v1204_v56, 0.0 }
 0x2d1   : > { %v1199_v62 = vadd.f32 %v2320_v24, %v1198_v61  ;;  %v1286_v1 = vmax.f32 %v1196_v58, 0.0 }
 0x2d2   : > { %v1289_v0 = vmax.f32 %v1207_v60, 0.0 }
 0x2d3   : > { %v1287_v2 = vmax.f32 %v1199_v62, 0.0  ;;  %v2374_v62 = vld [vmem:[%s2456_s8] ss:$0 sm:$0xff] }
 0x2d4   : > { %v1313_v3 = vpack.c.bf16 %v1289_v0, %v1288_v63 }
 0x2d5   : > { %v1312_v4 = vpack.c.bf16 %v1287_v2, %v1286_v1  ;;  %v1955_v5 = vpop.f32.mrb[48].mxu1 }
 0x2d6   : > { %v1220_v6 = vadd.f32 %v1955_v5, %v2320_v24  ;;  %v1211_v7 = vpop.f32.mrb[49].mxu1 }
 0x2d7   : > { %v1212_v8 = vadd.f32 %v2320_v24, %v1211_v7  ;;  %v1956_v9 = vpop.f32.mrb[50].mxu1  ;;  %1989 = vmatprep.mubr.msk.bf16.mxu0 %vm784_vm0, %v1312_v4 }
 0x2d8   : > { %v1223_v10 = vadd.f32 %v1956_v9, %v2320_v24  ;;  %v1214_v11 = vpop.f32.mrb[51].mxu1  ;;  %1990 = vmatmul.mubr.msk.bf16.gmra.mrb[44].mxu0 %vm784_vm0, %v1313_v3  ;;  %v1292_v13 = vmax.f32 %v1220_v6, 0.0 }
 0x2d9   : > { %v1215_v12 = vadd.f32 %v2320_v24, %v1214_v11  ;;  %v1290_v15 = vmax.f32 %v1212_v8, 0.0 }
 0x2da   : > { %v1293_v14 = vmax.f32 %v1223_v10, 0.0 }
 0x2db   : > { %v1291_v16 = vmax.f32 %v1215_v12, 0.0 }
 0x2dc   : > { %v1315_v17 = vpack.c.bf16 %v1293_v14, %v1292_v13 }
 0x2dd   : > { %v1314_v18 = vpack.c.bf16 %v1291_v16, %v1290_v15  ;;  %v1959_v19 = vpop.f32.mrb[52].mxu1 }
 0x2de   : > { %v1236_v20 = vadd.f32 %v1959_v19, %v2320_v24  ;;  %v1227_v21 = vpop.f32.mrb[53].mxu1 }
 0x2df   : > { %v1228_v29 = vadd.f32 %v2320_v24, %v1227_v21  ;;  %v1960_v22 = vpop.f32.mrb[54].mxu1  ;;  %1993 = vmatprep.mubr.msk.bf16.mxu0 %vm784_vm0, %v1314_v18 }
 0x2e0   : > { %v1239_v23 = vadd.f32 %v1960_v22, %v2320_v24  ;;  %v1230_v25 = vpop.f32.mrb[55].mxu1  ;;  %1994 = vmatmul.mubr.msk.bf16.gmra.mrb[48].mxu0 %vm784_vm0, %v1315_v17  ;;  %v1296_v27 = vmax.f32 %v1236_v20, 0.0 }
 0x2e1   : > { %v1231_v26 = vadd.f32 %v2320_v24, %v1230_v25  ;;  %v1294_v30 = vmax.f32 %v1228_v29, 0.0 }
 0x2e2   : > { %v1297_v28 = vmax.f32 %v1239_v23, 0.0 }
 0x2e3   : > { %v1295_v31 = vmax.f32 %v1231_v26, 0.0 }
 0x2e4   : > { %v1317_v32 = vpack.c.bf16 %v1297_v28, %v1296_v27 }
 0x2e5   : > { %v1316_v33 = vpack.c.bf16 %v1295_v31, %v1294_v30  ;;  %v1963_v34 = vpop.f32.mrb[56].mxu1 }
 0x2e6   : > { %v1252_v35 = vadd.f32 %v1963_v34, %v2320_v24  ;;  %v1243_v36 = vpop.f32.mrb[57].mxu1 }
 0x2e7   : > { %v1244_v37 = vadd.f32 %v2320_v24, %v1243_v36  ;;  %v1964_v38 = vpop.f32.mrb[58].mxu1  ;;  %1997 = vmatprep.mubr.msk.bf16.mxu0 %vm784_vm0, %v1316_v33 }
 0x2e8   : > { %v1255_v39 = vadd.f32 %v1964_v38, %v2320_v24  ;;  %v1246_v40 = vpop.f32.mrb[59].mxu1  ;;  %1998 = vmatmul.mubr.msk.bf16.gmra.mrb[52].mxu0 %vm784_vm0, %v1317_v32  ;;  %v1300_v42 = vmax.f32 %v1252_v35, 0.0 }
 0x2e9   : > { %v1247_v41 = vadd.f32 %v2320_v24, %v1246_v40  ;;  %v1298_v44 = vmax.f32 %v1244_v37, 0.0 }
 0x2ea   : > { %v1301_v43 = vmax.f32 %v1255_v39, 0.0 }
 0x2eb   : > { %v1299_v45 = vmax.f32 %v1247_v41, 0.0 }
 0x2ec   : > { %v1319_v46 = vpack.c.bf16 %v1301_v43, %v1300_v42 }
 0x2ed   : > { %v1318_v47 = vpack.c.bf16 %v1299_v45, %v1298_v44  ;;  %v1967_v48 = vpop.f32.mrb[60].mxu1 }
 0x2ee   : > { %v1268_v49 = vadd.f32 %v1967_v48, %v2320_v24  ;;  %v1259_v50 = vpop.f32.mrb[61].mxu1 }
 0x2ef   : > { %v1260_v51 = vadd.f32 %v2320_v24, %v1259_v50  ;;  %v1968_v52 = vpop.f32.mrb[62].mxu1  ;;  %2001 = vmatprep.mubr.msk.bf16.mxu0 %vm784_vm0, %v1318_v47 }
 0x2f0   : > { %v1271_v53 = vadd.f32 %v1968_v52, %v2320_v24  ;;  %v1262_v54 = vpop.f32.mrb[63].mxu1  ;;  %2002 = vmatmul.mubr.msk.bf16.gmra.mrb[56].mxu0 %vm784_vm0, %v1319_v46  ;;  %v1304_v56 = vmax.f32 %v1268_v49, 0.0 }
 0x2f1   : > { %v1263_v55 = vadd.f32 %v2320_v24, %v1262_v54  ;;  %v1302_v58 = vmax.f32 %v1260_v51, 0.0 }
 0x2f2   : > { %v1305_v57 = vmax.f32 %v1271_v53, 0.0 }
 0x2f3   : > { %v1303_v59 = vmax.f32 %v1263_v55, 0.0 }
 0x2f4   : > { %v1321_v60 = vpack.c.bf16 %v1305_v57, %v1304_v56 }
 0x2f5   : > { %v1320_v61 = vpack.c.bf16 %v1303_v59, %v1302_v58 }
 0x2f7   : > { %2005 = vmatprep.mubr.msk.bf16.mxu1 %vm784_vm0, %v1320_v61 }
 0x2f8   : > { %2006 = vmatmul.mubr.msk.bf16.vlgmr.msra.gmra.mrb[64].mxu1 %vm784_vm0, %v1321_v60 }
 0x393   : > { %v1979_v24 = vpop.f32.mrb[32].mxu0 }
 0x394   : > { %v1452_v63 = vadd.f32 %v1979_v24, %v2374_v62  ;;  %v1443_v0 = vpop.f32.mrb[33].mxu0 }
 0x395   : > { %v1444_v1 = vadd.f32 %v2374_v62, %v1443_v0  ;;  %v1980_v2 = vpop.f32.mrb[34].mxu0 }
 0x396   : > { %1572 = vst [vmem:[%s2379_s18 + $0x10] sm:$0xff] %v1452_v63  ;;  %v1455_v3 = vadd.f32 %v1980_v2, %v2374_v62  ;;  %v1446_v4 = vpop.f32.mrb[35].mxu0 }
 0x397   : > { %1570 = vst [vmem:[%s2379_s18] sm:$0xff] %v1444_v1  ;;  %v1447_v5 = vadd.f32 %v2374_v62, %v1446_v4 }
 0x398   : > { %1573 = vst [vmem:[%s2379_s18 + $0x18] sm:$0xff] %v1455_v3 }
 0x399   : > { %1571 = vst [vmem:[%s2379_s18 + $0x8] sm:$0xff] %v1447_v5 }
 0x39b   : > { %v1983_v6 = vpop.f32.mrb[36].mxu0 }
 0x39c   : > { %v1468_v7 = vadd.f32 %v1983_v6, %v2374_v62  ;;  %v1459_v8 = vpop.f32.mrb[37].mxu0 }
 0x39d   : > { %v1460_v9 = vadd.f32 %v2374_v62, %v1459_v8  ;;  %v1984_v10 = vpop.f32.mrb[38].mxu0 }
 0x39e   : > { %1576 = vst [vmem:[%s2379_s18 + $0x30] sm:$0xff] %v1468_v7  ;;  %v1471_v11 = vadd.f32 %v1984_v10, %v2374_v62  ;;  %v1462_v12 = vpop.f32.mrb[39].mxu0 }
 0x39f   : > { %1574 = vst [vmem:[%s2379_s18 + $0x20] sm:$0xff] %v1460_v9  ;;  %v1463_v13 = vadd.f32 %v2374_v62, %v1462_v12 }
 0x3a0   : > { %1577 = vst [vmem:[%s2379_s18 + $0x38] sm:$0xff] %v1471_v11 }
 0x3a1   : > { %1575 = vst [vmem:[%s2379_s18 + $0x28] sm:$0xff] %v1463_v13 }
 0x3a3   : > { %v1987_v14 = vpop.f32.mrb[40].mxu0 }
 0x3a4   : > { %v1484_v15 = vadd.f32 %v1987_v14, %v2374_v62  ;;  %v1475_v16 = vpop.f32.mrb[41].mxu0 }
 0x3a5   : > { %v1476_v17 = vadd.f32 %v2374_v62, %v1475_v16  ;;  %v1988_v18 = vpop.f32.mrb[42].mxu0 }
 0x3a6   : > { %1580 = vst [vmem:[%s2379_s18 + $0x50] sm:$0xff] %v1484_v15  ;;  %v1487_v19 = vadd.f32 %v1988_v18, %v2374_v62  ;;  %v1478_v20 = vpop.f32.mrb[43].mxu0 }
 0x3a7   : > { %1578 = vst [vmem:[%s2379_s18 + $0x40] sm:$0xff] %v1476_v17  ;;  %v1479_v21 = vadd.f32 %v2374_v62, %v1478_v20 }
 0x3a8   : > { %1581 = vst [vmem:[%s2379_s18 + $0x58] sm:$0xff] %v1487_v19 }
 0x3a9   : > { %1579 = vst [vmem:[%s2379_s18 + $0x48] sm:$0xff] %v1479_v21 }
 0x3ab   : > { %v1991_v29 = vpop.f32.mrb[44].mxu0 }
 0x3ac   : > { %v1500_v22 = vadd.f32 %v1991_v29, %v2374_v62  ;;  %v1491_v23 = vpop.f32.mrb[45].mxu0 }
 0x3ad   : > { %v1492_v25 = vadd.f32 %v2374_v62, %v1491_v23  ;;  %v1992_v26 = vpop.f32.mrb[46].mxu0 }
 0x3ae   : > { %1584 = vst [vmem:[%s2379_s18 + $0x70] sm:$0xff] %v1500_v22  ;;  %v1503_v27 = vadd.f32 %v1992_v26, %v2374_v62  ;;  %v1494_v28 = vpop.f32.mrb[47].mxu0 }
 0x3af   : > { %1582 = vst [vmem:[%s2379_s18 + $0x60] sm:$0xff] %v1492_v25  ;;  %v1495_v30 = vadd.f32 %v2374_v62, %v1494_v28 }
 0x3b0   : > { %1585 = vst [vmem:[%s2379_s18 + $0x78] sm:$0xff] %v1503_v27 }
 0x3b1   : > { %1583 = vst [vmem:[%s2379_s18 + $0x68] sm:$0xff] %v1495_v30 }
 0x3b3   : > { %v1995_v31 = vpop.f32.mrb[48].mxu0 }
 0x3b4   : > { %v1516_v32 = vadd.f32 %v1995_v31, %v2374_v62  ;;  %v1507_v33 = vpop.f32.mrb[49].mxu0 }
 0x3b5   : > { %v1508_v34 = vadd.f32 %v2374_v62, %v1507_v33  ;;  %v1996_v35 = vpop.f32.mrb[50].mxu0 }
 0x3b6   : > { %1588 = vst [vmem:[%s2379_s18 + $0x90] sm:$0xff] %v1516_v32  ;;  %v1519_v36 = vadd.f32 %v1996_v35, %v2374_v62  ;;  %v1510_v37 = vpop.f32.mrb[51].mxu0 }
 0x3b7   : > { %1586 = vst [vmem:[%s2379_s18 + $0x80] sm:$0xff] %v1508_v34  ;;  %v1511_v38 = vadd.f32 %v2374_v62, %v1510_v37 }
 0x3b8   : > { %1589 = vst [vmem:[%s2379_s18 + $0x98] sm:$0xff] %v1519_v36 }
 0x3b9   : > { %1587 = vst [vmem:[%s2379_s18 + $0x88] sm:$0xff] %v1511_v38 }
 0x3bb   : > { %v1999_v39 = vpop.f32.mrb[52].mxu0 }
 0x3bc   : > { %v1532_v40 = vadd.f32 %v1999_v39, %v2374_v62  ;;  %v1523_v41 = vpop.f32.mrb[53].mxu0 }
 0x3bd   : > { %v1524_v42 = vadd.f32 %v2374_v62, %v1523_v41  ;;  %v2000_v43 = vpop.f32.mrb[54].mxu0 }
 0x3be   : > { %1592 = vst [vmem:[%s2379_s18 + $0xb0] sm:$0xff] %v1532_v40  ;;  %v1535_v44 = vadd.f32 %v2000_v43, %v2374_v62  ;;  %v1526_v45 = vpop.f32.mrb[55].mxu0 }
 0x3bf   : > { %1590 = vst [vmem:[%s2379_s18 + $0xa0] sm:$0xff] %v1524_v42  ;;  %v1527_v46 = vadd.f32 %v2374_v62, %v1526_v45 }
 0x3c0   : > { %1593 = vst [vmem:[%s2379_s18 + $0xb8] sm:$0xff] %v1535_v44 }
 0x3c1   : > { %1591 = vst [vmem:[%s2379_s18 + $0xa8] sm:$0xff] %v1527_v46 }
 0x3c3   : > { %v2003_v47 = vpop.f32.mrb[56].mxu0 }
 0x3c4   : > { %v1548_v48 = vadd.f32 %v2003_v47, %v2374_v62  ;;  %v1539_v49 = vpop.f32.mrb[57].mxu0 }
 0x3c5   : > { %v1540_v50 = vadd.f32 %v2374_v62, %v1539_v49  ;;  %v2004_v51 = vpop.f32.mrb[58].mxu0 }
 0x3c6   : > { %1596 = vst [vmem:[%s2379_s18 + $0xd0] sm:$0xff] %v1548_v48  ;;  %v1551_v52 = vadd.f32 %v2004_v51, %v2374_v62  ;;  %v1542_v53 = vpop.f32.mrb[59].mxu0 }
 0x3c7   : > { %1594 = vst [vmem:[%s2379_s18 + $0xc0] sm:$0xff] %v1540_v50  ;;  %v1543_v54 = vadd.f32 %v2374_v62, %v1542_v53 }
 0x3c8   : > { %1597 = vst [vmem:[%s2379_s18 + $0xd8] sm:$0xff] %v1551_v52 }
 0x3c9   : > { %1595 = vst [vmem:[%s2379_s18 + $0xc8] sm:$0xff] %v1543_v54 }
 0x3cb   : > { %v2007_v55 = vpop.f32.mrb[64].mxu1 }
 0x3cc   : > { %v1564_v56 = vadd.f32 %v2007_v55, %v2374_v62  ;;  %v1555_v57 = vpop.f32.mrb[65].mxu1 }
 0x3cd   : > { %v1556_v58 = vadd.f32 %v2374_v62, %v1555_v57  ;;  %v2008_v59 = vpop.f32.mrb[66].mxu1 }
 0x3ce   : > { %1600 = vst [vmem:[%s2379_s18 + $0xf0] sm:$0xff] %v1564_v56  ;;  %v1567_v60 = vadd.f32 %v2008_v59, %v2374_v62  ;;  %v1558_v61 = vpop.f32.mrb[67].mxu1 }
 0x3cf   : > { %1598 = vst [vmem:[%s2379_s18 + $0xe0] sm:$0xff] %v1556_v58  ;;  %v1559_v24 = vadd.f32 %v2374_v62, %v1558_v61 }
 0x3d0   : > { %1601 = vst [vmem:[%s2379_s18 + $0xf8] sm:$0xff] %v1567_v60 }
 0x3d1   : > { %1599 = vst [vmem:[%s2379_s18 + $0xe8] sm:$0xff] %v1559_v24 }
 0x3d2 PF: > { %s19_s30 = sadd.s32 1, %s2071_s30  }
 0x3d3   : > { %p16_p4 = scmp.ge.s32.totalorder %s19_s30, 4  }
 0x3d5   :  { %18 = sbr.rel (!%p16_p4) target bundleno = 1 (0x1), region = 86 }

</bundles_post_ra>
